<compile_context>
chip_gen: v6e
topology: v6e:2x2x1
jax: 0.10.0
libtpu: 0.0.40
codegen_flags: <defaults>
</compile_context>

<pallas_src>
import math
import functools

import numpy as np
import jax
import jax.numpy as jnp
from jax.experimental import pallas as pl
from jax.experimental.pallas import tpu as pltpu


# ---------------------------------------------------------------------------
# Pallas kernel: fused upsample + reflection-pad + conv + bias
# ---------------------------------------------------------------------------
def _reduced_conv_kernel(x_ref, ahp_ref, ww_ref, be_ref, o_ref):
    # x_ref  : (N, H, C*W)       input rows, (c, w) packed on lanes
    # ahp_ref: (kh, Ho, H)       per-height-tap upsample+reflect-pad matrices
    # ww_ref : (kh, C*W, O*Wo)   per-tap folded (width-upsample+pad+conv) weights
    # be_ref : (1, O*Wo)         bias expanded over the wo lanes
    # o_ref  : (N, Ho, O*Wo)     lane-dense output (last dim = O*Wo)
    n_batch = x_ref.shape[0]
    kh = ww_ref.shape[0]
    bias = be_ref[...]                                      # (1, O*Wo)

    for n in range(n_batch):                                # static unroll (N small)
        xn = x_ref[n]                                       # (H, C*W)
        # tap 0 (initializes the accumulator, bias fused in)
        xh = jnp.dot(ahp_ref[0], xn, preferred_element_type=jnp.float32)       # (Ho, C*W)
        acc = jnp.dot(xh, ww_ref[0], preferred_element_type=jnp.float32) + bias  # (Ho, O*Wo)
        # remaining height taps (static unroll, kh is tiny)
        for di in range(1, kh):
            xh = jnp.dot(ahp_ref[di], xn, preferred_element_type=jnp.float32)
            acc = acc + jnp.dot(xh, ww_ref[di], preferred_element_type=jnp.float32)
        o_ref[n] = acc.astype(o_ref.dtype)


def _reduced_conv_call(x_r, ahp_s, ww, bias_e):
    N, H, CW = x_r.shape
    kh, Ho, H2 = ahp_s.shape
    kh2, CW2, OW = ww.shape
    assert H == H2 and CW == CW2 and kh == kh2
    return pl.pallas_call(
        _reduced_conv_kernel,
        out_shape=jax.ShapeDtypeStruct((N, Ho, OW), jnp.float32),
        grid=(1,),  # single grid step: everything fits comfortably in VMEM
        in_specs=[
            pl.BlockSpec((N, H, CW), lambda i: (0, 0, 0)),
            pl.BlockSpec((kh, Ho, H), lambda i: (0, 0, 0)),
            pl.BlockSpec((kh, CW, OW), lambda i: (0, 0, 0)),
            pl.BlockSpec((1, OW), lambda i: (0, 0)),
        ],
        out_specs=pl.BlockSpec((N, Ho, OW), lambda i: (0, 0, 0)),
        compiler_params=pltpu.CompilerParams(
            dimension_semantics=("arbitrary",)),
    )(x_r, ahp_s, ww, bias_e)


# ---------------------------------------------------------------------------
# Host-side (numpy, trace-time) construction of the linear-map matrices
# ---------------------------------------------------------------------------
def _interp_matrix(out_size, in_size, scale):
    # PyTorch nn.Upsample(scale_factor=s, mode='bilinear', align_corners=False,
    # recompute_scale_factor=None): src = max((d + 0.5)/s - 0.5, 0)
    # NOTE: if PyTorch were configured to recompute the scale from the integer
    # output size, coordinates could differ by ~1e-4 for other configs.
    r = np.float32(1.0 / scale)
    d = np.arange(out_size, dtype=np.float32)
    src = np.maximum(r * (d + np.float32(0.5)) - np.float32(0.5), np.float32(0.0))
    i0 = np.minimum(np.floor(src).astype(np.int64), in_size - 1)
    i1 = np.minimum(i0 + 1, in_size - 1)
    l1 = (src - i0.astype(np.float32)).astype(np.float32)
    l0 = np.float32(1.0) - l1
    A = np.zeros((out_size, in_size), dtype=np.float32)
    A[np.arange(out_size), i0] += l0
    A[np.arange(out_size), i1] += l1
    return A


def _refl_idx(size):
    # nn.ReflectionPad2d(1): index -1 -> 1, index `size` -> size-2
    assert size >= 2, "ReflectionPad2d(1) needs spatial size >= 2"
    return np.array([1] + list(range(size)) + [size - 2], dtype=np.int64)


# ---------------------------------------------------------------------------
# ReducedConv forward (NCHW in / NCHW out)
# ---------------------------------------------------------------------------
def reduced_conv_forward(x_nchw, weight, bias, *, input_dim, output_dim, kernel_size):
    eps = 0.001
    scale = float(output_dim + kernel_size - 3 + eps) / float(input_dim)
    N, C, H, W = x_nchw.shape
    Hu, Wu = int(math.floor(H * scale)), int(math.floor(W * scale))  # floor(size*scale)
    kh = kw = int(kernel_size)
    Hp, Wp = Hu + 2, Wu + 2
    Ho, Wo = Hp - kh + 1, Wp - kw + 1
    O = weight.shape[0]

    # trace-time constants: upsample + reflection-pad as matrices (zero XLA ops)
    AhP = _interp_matrix(Hu, H, scale)[_refl_idx(Hu)]        # (Hp, H)
    AwP = _interp_matrix(Wu, W, scale)[_refl_idx(Wu)]        # (Wp, W)
    ahp_s = np.stack([AhP[di:di + Ho, :] for di in range(kh)], axis=0)   # (kh, Ho, H)
    S = np.stack([AwP[dj:dj + Wo, :] for dj in range(kw)], axis=0)       # (kw, Wo, W)

    # fold width upsample + pad + the kw conv taps into the weights:
    #   WW[di, c*W + w, o*Wo + wo] = sum_dj weight[o, c, di, dj] * AwP[wo + dj, w]
    WW = jnp.einsum('ocad,dvb->acbov', weight, jnp.asarray(S),
                    precision=jax.lax.Precision.HIGHEST)                 # (kh,C,W,O,Wo)
    WW = WW.reshape(kh, C * W, O * Wo)
    bias_e = jnp.repeat(bias, Wo).reshape(1, O * Wo)

    # x: NCHW -> (N, H, C*W) so the height contraction is a plain 2-D matmul
    x_r = jnp.transpose(x_nchw, (0, 2, 1, 3)).reshape(N, H, C * W)

    out = _reduced_conv_call(x_r, jnp.asarray(ahp_s), WW, bias_e)        # (N, Ho, O*Wo)
    out = out.reshape(N, Ho, O, Wo)
    return jnp.transpose(out, (0, 2, 1, 3))                              # -> (N, O, Ho, Wo)


# ---------------------------------------------------------------------------
# Independent pure-JAX reference (gather-based) used only for the self-check
# ---------------------------------------------------------------------------
def _upsample_axis_indices(out_size, in_size, scale_factor):
    r = 1.0 / scale_factor
    d = jnp.arange(out_size, dtype=jnp.float32)
    src = jnp.maximum(r * (d + 0.5) - 0.5, 0.0)
    i0 = jnp.minimum(jnp.floor(src).astype(jnp.int32), in_size - 1)
    i1 = jnp.minimum(i0 + 1, in_size - 1)
    l1 = src - i0.astype(jnp.float32)
    return i0, i1, 1.0 - l1, l1


def bilinear_upsample_nhwc(x, out_h, out_w, scale_factor):
    N, H, W, C = x.shape
    h0, h1, lh0, lh1 = _upsample_axis_indices(out_h, H, scale_factor)
    w0, w1, lw0, lw1 = _upsample_axis_indices(out_w, W, scale_factor)
    xh = x[:, h0] * lh0[None, :, None, None] + x[:, h1] * lh1[None, :, None, None]
    return (xh[:, :, w0] * lw0[None, None, :, None]
            + xh[:, :, w1] * lw1[None, None, :, None])


def reflection_pad1_nhwc(x):
    N, H, W, C = x.shape
    hi = jnp.asarray(_refl_idx(H))
    wi = jnp.asarray(_refl_idx(W))
    return x[:, hi][:, :, wi]


# ---------------------------------------------------------------------------
if __name__ == "__main__":
    key = jax.random.PRNGKey(0)
    k1, k2, k3 = jax.random.split(key, 3)

    # ReducedConv(input_size=4, output_size=8, input_dim=16, output_dim=16, kernel_size=3)
    N, C, H, W = 2, 4, 16, 16
    O, kernel_size = 8, 3
    input_dim, output_dim = 16, 16

    x = jax.random.normal(k1, (N, C, H, W), jnp.float32)
    fan_in = C * kernel_size * kernel_size
    bound = 1.0 / math.sqrt(fan_in)
    weight = jax.random.uniform(k2, (O, C, kernel_size, kernel_size), jnp.float32,
                                minval=-bound, maxval=bound)
    bias = jax.random.uniform(k3, (O,), jnp.float32, minval=-bound, maxval=bound)

    fwd = jax.jit(functools.partial(reduced_conv_forward, input_dim=input_dim,
                                    output_dim=output_dim, kernel_size=kernel_size))
    y = jax.block_until_ready(fwd(x, weight, bias))
    assert y.shape == (N, O, output_dim, output_dim), y.shape

    # Self-check: fused Pallas pipeline vs independent gather-based upsample/pad + lax.conv
    eps = 0.001
    scale = float(output_dim + kernel_size - 3 + eps) / float(input_dim)
    Hu, Wu = int(math.floor(H * scale)), int(math.floor(W * scale))
    x_nhwc = jnp.transpose(x, (0, 2, 3, 1))
    xp = reflection_pad1_nhwc(bilinear_upsample_nhwc(x_nhwc, Hu, Wu, scale))
    ref = jax.lax.conv_general_dilated(
        jnp.transpose(xp, (0, 3, 1, 2)), weight, window_strides=(1, 1),
        padding="VALID", precision=jax.lax.Precision.HIGHEST
    ) + bias[None, :, None, None]
    assert jnp.allclose(y, ref, atol=2e-4, rtol=2e-4), float(jnp.max(jnp.abs(y - ref)))

    print("KERNEL_OK")
</pallas_src>

<mosaic_0001>
module attributes {stable_mosaic.version = 11 : i64} {
  func.func @_reduced_conv_kernel(%arg0: i32, %arg1: memref<2x16x64xf32, #tpu.memory_space<vmem>>, %arg2: memref<3x16x16xf32, #tpu.memory_space<vmem>>, %arg3: memref<3x64x128xf32, #tpu.memory_space<vmem>>, %arg4: memref<1x128xf32, #tpu.memory_space<vmem>>, %arg5: memref<2x16x128xf32, #tpu.memory_space<vmem>>) attributes {dimension_semantics = [#tpu.dimension_semantics<arbitrary>], iteration_bounds = array<i64: 1>, scalar_prefetch = 0 : i64, scratch_operands = 0 : i64, tpu.core_type = #tpu.core_type<tc>, window_params = [{pipeline_mode = #tpu.pipeline_mode<synchronous>, transform_indices = @transform_0, window_bounds = array<i64: 2, 16, 64>}, {pipeline_mode = #tpu.pipeline_mode<synchronous>, transform_indices = @transform_1, window_bounds = array<i64: 3, 16, 16>}, {pipeline_mode = #tpu.pipeline_mode<synchronous>, transform_indices = @transform_2, window_bounds = array<i64: 3, 64, 128>}, {pipeline_mode = #tpu.pipeline_mode<synchronous>, transform_indices = @transform_3, window_bounds = array<i64: 1, 128>}, {pipeline_mode = #tpu.pipeline_mode<synchronous>, transform_indices = @transform_4, window_bounds = array<i64: 2, 16, 128>}]} {
    %c0 = arith.constant 0 : index
    %c0_0 = arith.constant 0 : index
    %0 = vector.load %arg4[%c0, %c0_0] : memref<1x128xf32, #tpu.memory_space<vmem>>, vector<1x128xf32>
    %c0_1 = arith.constant 0 : index
    %c0_2 = arith.constant 0 : index
    %c0_3 = arith.constant 0 : index
    %1 = vector.load %arg1[%c0_1, %c0_2, %c0_3] : memref<2x16x64xf32, #tpu.memory_space<vmem>>, vector<1x16x64xf32>
    %2 = vector.shape_cast %1 : vector<1x16x64xf32> to vector<16x64xf32>
    %c0_4 = arith.constant 0 : index
    %c0_5 = arith.constant 0 : index
    %c0_6 = arith.constant 0 : index
    %3 = vector.load %arg2[%c0_4, %c0_5, %c0_6] : memref<3x16x16xf32, #tpu.memory_space<vmem>>, vector<1x16x16xf32>
    %4 = vector.shape_cast %3 : vector<1x16x16xf32> to vector<16x16xf32>
    %cst = arith.constant dense<0.000000e+00> : vector<16x64xf32>
    %5 = tpu.matmul %4, %2, %cst {dimension_numbers = #tpu.dot_dimension_numbers<[1], [0], [0], [1], [0, 0, 1, 1], [], []>} : vector<16x16xf32>, vector<16x64xf32>, vector<16x64xf32> -> vector<16x64xf32>
    %c0_7 = arith.constant 0 : index
    %c0_8 = arith.constant 0 : index
    %c0_9 = arith.constant 0 : index
    %6 = vector.load %arg3[%c0_7, %c0_8, %c0_9] : memref<3x64x128xf32, #tpu.memory_space<vmem>>, vector<1x64x128xf32>
    %7 = vector.shape_cast %6 : vector<1x64x128xf32> to vector<64x128xf32>
    %cst_10 = arith.constant dense<0.000000e+00> : vector<16x128xf32>
    %8 = tpu.matmul %5, %7, %cst_10 {dimension_numbers = #tpu.dot_dimension_numbers<[1], [0], [0], [1], [0, 0, 1, 1], [], []>} : vector<16x64xf32>, vector<64x128xf32>, vector<16x128xf32> -> vector<16x128xf32>
    %9 = vector.broadcast %0 : vector<1x128xf32> to vector<16x128xf32>
    %10 = arith.addf %8, %9 : vector<16x128xf32>
    %c1 = arith.constant 1 : index
    %c0_11 = arith.constant 0 : index
    %c0_12 = arith.constant 0 : index
    %11 = vector.load %arg2[%c1, %c0_11, %c0_12] : memref<3x16x16xf32, #tpu.memory_space<vmem>>, vector<1x16x16xf32>
    %12 = vector.shape_cast %11 : vector<1x16x16xf32> to vector<16x16xf32>
    %cst_13 = arith.constant dense<0.000000e+00> : vector<16x64xf32>
    %13 = tpu.matmul %12, %2, %cst_13 {dimension_numbers = #tpu.dot_dimension_numbers<[1], [0], [0], [1], [0, 0, 1, 1], [], []>} : vector<16x16xf32>, vector<16x64xf32>, vector<16x64xf32> -> vector<16x64xf32>
    %c1_14 = arith.constant 1 : index
    %c0_15 = arith.constant 0 : index
    %c0_16 = arith.constant 0 : index
    %14 = vector.load %arg3[%c1_14, %c0_15, %c0_16] : memref<3x64x128xf32, #tpu.memory_space<vmem>>, vector<1x64x128xf32>
    %15 = vector.shape_cast %14 : vector<1x64x128xf32> to vector<64x128xf32>
    %cst_17 = arith.constant dense<0.000000e+00> : vector<16x128xf32>
    %16 = tpu.matmul %13, %15, %cst_17 {dimension_numbers = #tpu.dot_dimension_numbers<[1], [0], [0], [1], [0, 0, 1, 1], [], []>} : vector<16x64xf32>, vector<64x128xf32>, vector<16x128xf32> -> vector<16x128xf32>
    %17 = arith.addf %10, %16 : vector<16x128xf32>
    %c2 = arith.constant 2 : index
    %c0_18 = arith.constant 0 : index
    %c0_19 = arith.constant 0 : index
    %18 = vector.load %arg2[%c2, %c0_18, %c0_19] : memref<3x16x16xf32, #tpu.memory_space<vmem>>, vector<1x16x16xf32>
    %19 = vector.shape_cast %18 : vector<1x16x16xf32> to vector<16x16xf32>
    %cst_20 = arith.constant dense<0.000000e+00> : vector<16x64xf32>
    %20 = tpu.matmul %19, %2, %cst_20 {dimension_numbers = #tpu.dot_dimension_numbers<[1], [0], [0], [1], [0, 0, 1, 1], [], []>} : vector<16x16xf32>, vector<16x64xf32>, vector<16x64xf32> -> vector<16x64xf32>
    %c2_21 = arith.constant 2 : index
    %c0_22 = arith.constant 0 : index
    %c0_23 = arith.constant 0 : index
    %21 = vector.load %arg3[%c2_21, %c0_22, %c0_23] : memref<3x64x128xf32, #tpu.memory_space<vmem>>, vector<1x64x128xf32>
    %22 = vector.shape_cast %21 : vector<1x64x128xf32> to vector<64x128xf32>
    %cst_24 = arith.constant dense<0.000000e+00> : vector<16x128xf32>
    %23 = tpu.matmul %20, %22, %cst_24 {dimension_numbers = #tpu.dot_dimension_numbers<[1], [0], [0], [1], [0, 0, 1, 1], [], []>} : vector<16x64xf32>, vector<64x128xf32>, vector<16x128xf32> -> vector<16x128xf32>
    %24 = arith.addf %17, %23 : vector<16x128xf32>
    %c0_25 = arith.constant 0 : index
    %c0_26 = arith.constant 0 : index
    %c0_27 = arith.constant 0 : index
    %25 = vector.load %arg5[%c0_25, %c0_26, %c0_27] : memref<2x16x128xf32, #tpu.memory_space<vmem>>, vector<1x16x128xf32>
    %26 = vector.shape_cast %25 : vector<1x16x128xf32> to vector<16x128xf32>
    %27 = vector.shape_cast %24 : vector<16x128xf32> to vector<1x16x128xf32>
    tpu.vector_store %arg5[%c0_25, %c0_26, %c0_27], %27 {strides = array<i32>} : memref<2x16x128xf32, #tpu.memory_space<vmem>>, vector<1x16x128xf32>,
    %c1_28 = arith.constant 1 : index
    %c0_29 = arith.constant 0 : index
    %c0_30 = arith.constant 0 : index
    %28 = vector.load %arg1[%c1_28, %c0_29, %c0_30] : memref<2x16x64xf32, #tpu.memory_space<vmem>>, vector<1x16x64xf32>
    %29 = vector.shape_cast %28 : vector<1x16x64xf32> to vector<16x64xf32>
    %c0_31 = arith.constant 0 : index
    %c0_32 = arith.constant 0 : index
    %c0_33 = arith.constant 0 : index
    %30 = vector.load %arg2[%c0_31, %c0_32, %c0_33] : memref<3x16x16xf32, #tpu.memory_space<vmem>>, vector<1x16x16xf32>
    %31 = vector.shape_cast %30 : vector<1x16x16xf32> to vector<16x16xf32>
    %cst_34 = arith.constant dense<0.000000e+00> : vector<16x64xf32>
    %32 = tpu.matmul %31, %29, %cst_34 {dimension_numbers = #tpu.dot_dimension_numbers<[1], [0], [0], [1], [0, 0, 1, 1], [], []>} : vector<16x16xf32>, vector<16x64xf32>, vector<16x64xf32> -> vector<16x64xf32>
    %c0_35 = arith.constant 0 : index
    %c0_36 = arith.constant 0 : index
    %c0_37 = arith.constant 0 : index
    %33 = vector.load %arg3[%c0_35, %c0_36, %c0_37] : memref<3x64x128xf32, #tpu.memory_space<vmem>>, vector<1x64x128xf32>
    %34 = vector.shape_cast %33 : vector<1x64x128xf32> to vector<64x128xf32>
    %cst_38 = arith.constant dense<0.000000e+00> : vector<16x128xf32>
    %35 = tpu.matmul %32, %34, %cst_38 {dimension_numbers = #tpu.dot_dimension_numbers<[1], [0], [0], [1], [0, 0, 1, 1], [], []>} : vector<16x64xf32>, vector<64x128xf32>, vector<16x128xf32> -> vector<16x128xf32>
    %36 = vector.broadcast %0 : vector<1x128xf32> to vector<16x128xf32>
    %37 = arith.addf %35, %36 : vector<16x128xf32>
    %c1_39 = arith.constant 1 : index
    %c0_40 = arith.constant 0 : index
    %c0_41 = arith.constant 0 : index
    %38 = vector.load %arg2[%c1_39, %c0_40, %c0_41] : memref<3x16x16xf32, #tpu.memory_space<vmem>>, vector<1x16x16xf32>
    %39 = vector.shape_cast %38 : vector<1x16x16xf32> to vector<16x16xf32>
    %cst_42 = arith.constant dense<0.000000e+00> : vector<16x64xf32>
    %40 = tpu.matmul %39, %29, %cst_42 {dimension_numbers = #tpu.dot_dimension_numbers<[1], [0], [0], [1], [0, 0, 1, 1], [], []>} : vector<16x16xf32>, vector<16x64xf32>, vector<16x64xf32> -> vector<16x64xf32>
    %c1_43 = arith.constant 1 : index
    %c0_44 = arith.constant 0 : index
    %c0_45 = arith.constant 0 : index
    %41 = vector.load %arg3[%c1_43, %c0_44, %c0_45] : memref<3x64x128xf32, #tpu.memory_space<vmem>>, vector<1x64x128xf32>
    %42 = vector.shape_cast %41 : vector<1x64x128xf32> to vector<64x128xf32>
    %cst_46 = arith.constant dense<0.000000e+00> : vector<16x128xf32>
    %43 = tpu.matmul %40, %42, %cst_46 {dimension_numbers = #tpu.dot_dimension_numbers<[1], [0], [0], [1], [0, 0, 1, 1], [], []>} : vector<16x64xf32>, vector<64x128xf32>, vector<16x128xf32> -> vector<16x128xf32>
    %44 = arith.addf %37, %43 : vector<16x128xf32>
    %c2_47 = arith.constant 2 : index
    %c0_48 = arith.constant 0 : index
    %c0_49 = arith.constant 0 : index
    %45 = vector.load %arg2[%c2_47, %c0_48, %c0_49] : memref<3x16x16xf32, #tpu.memory_space<vmem>>, vector<1x16x16xf32>
    %46 = vector.shape_cast %45 : vector<1x16x16xf32> to vector<16x16xf32>
    %cst_50 = arith.constant dense<0.000000e+00> : vector<16x64xf32>
    %47 = tpu.matmul %46, %29, %cst_50 {dimension_numbers = #tpu.dot_dimension_numbers<[1], [0], [0], [1], [0, 0, 1, 1], [], []>} : vector<16x16xf32>, vector<16x64xf32>, vector<16x64xf32> -> vector<16x64xf32>
    %c2_51 = arith.constant 2 : index
    %c0_52 = arith.constant 0 : index
    %c0_53 = arith.constant 0 : index
    %48 = vector.load %arg3[%c2_51, %c0_52, %c0_53] : memref<3x64x128xf32, #tpu.memory_space<vmem>>, vector<1x64x128xf32>
    %49 = vector.shape_cast %48 : vector<1x64x128xf32> to vector<64x128xf32>
    %cst_54 = arith.constant dense<0.000000e+00> : vector<16x128xf32>
    %50 = tpu.matmul %47, %49, %cst_54 {dimension_numbers = #tpu.dot_dimension_numbers<[1], [0], [0], [1], [0, 0, 1, 1], [], []>} : vector<16x64xf32>, vector<64x128xf32>, vector<16x128xf32> -> vector<16x128xf32>
    %51 = arith.addf %44, %50 : vector<16x128xf32>
    %c1_55 = arith.constant 1 : index
    %c0_56 = arith.constant 0 : index
    %c0_57 = arith.constant 0 : index
    %52 = vector.load %arg5[%c1_55, %c0_56, %c0_57] : memref<2x16x128xf32, #tpu.memory_space<vmem>>, vector<1x16x128xf32>
    %53 = vector.shape_cast %52 : vector<1x16x128xf32> to vector<16x128xf32>
    %54 = vector.shape_cast %51 : vector<16x128xf32> to vector<1x16x128xf32>
    tpu.vector_store %arg5[%c1_55, %c0_56, %c0_57], %54 {strides = array<i32>} : memref<2x16x128xf32, #tpu.memory_space<vmem>>, vector<1x16x128xf32>,
    return
  }
  func.func @transform_0(%arg0: i32) -> (i32, i32, i32) {
    %c0_i32 = arith.constant 0 : i32
    %c0_i32_0 = arith.constant 0 : i32
    %c0_i32_1 = arith.constant 0 : i32
    %c0_i32_2 = arith.constant 0 : i32
    return %c0_i32, %c0_i32_0, %c0_i32_1 : i32, i32, i32
  }
  func.func @transform_1(%arg0: i32) -> (i32, i32, i32) {
    %c0_i32 = arith.constant 0 : i32
    %c0_i32_0 = arith.constant 0 : i32
    %c0_i32_1 = arith.constant 0 : i32
    %c0_i32_2 = arith.constant 0 : i32
    return %c0_i32, %c0_i32_0, %c0_i32_1 : i32, i32, i32
  }
  func.func @transform_2(%arg0: i32) -> (i32, i32, i32) {
    %c0_i32 = arith.constant 0 : i32
    %c0_i32_0 = arith.constant 0 : i32
    %c0_i32_1 = arith.constant 0 : i32
    %c0_i32_2 = arith.constant 0 : i32
    return %c0_i32, %c0_i32_0, %c0_i32_1 : i32, i32, i32
  }
  func.func @transform_3(%arg0: i32) -> (i32, i32) {
    %c0_i32 = arith.constant 0 : i32
    %c0_i32_0 = arith.constant 0 : i32
    %c0_i32_1 = arith.constant 0 : i32
    return %c0_i32, %c0_i32_0 : i32, i32
  }
  func.func @transform_4(%arg0: i32) -> (i32, i32, i32) {
    %c0_i32 = arith.constant 0 : i32
    %c0_i32_0 = arith.constant 0 : i32
    %c0_i32_1 = arith.constant 0 : i32
    %c0_i32_2 = arith.constant 0 : i32
    return %c0_i32, %c0_i32_0, %c0_i32_1 : i32, i32, i32
  }
}

</mosaic_0001>

<bundles_post_ra>
// kernel: reduced_conv_forward.1
= control target key start
LH: loop header
LB: loop body
LE: loop exit
PB: predicated region body
PF: predicated region fallthrough
CT: control target
= control target key end

     0   :  { %vm22_vm0 = vcmask 130048   ;;  %vm118_vm1 = vcmask 523264   ;;  %s1747_s0 = inlined_call_operand.vmem [shape: f32[2,16,64], index: 0, kind: input, shape index: {}]   ;;  %s1748_s1 = inlined_call_operand.vmem [shape: f32[3,16,16], index: 1, kind: input, shape index: {}]   ;;  %s1749_s2 = inlined_call_operand.vmem [shape: f32[3,64,128], index: 2, kind: input, shape index: {}]   ;;  %s1750_s3 = inlined_call_operand.vmem [shape: f32[1,128], index: 3, kind: input, shape index: {}]   ;;  %s1751_s4 = inlined_call_operand.vmem [shape: f32[2,16,128], index: 4, kind: output, shape index: {}]  }
   0x1   :  { %v1421_v0 = vld [vmem:[%s1747_s0 + $0x8] sm:$0xff]  ;;  %v1426_v1 = vld [vmem:[%s1747_s0] sm:$0xff]  ;;  %v1440_v3 = vld [vmem:[%s1748_s1 + $0x10] sm:$0xff] }
   0x2   :  { %1237 = vmatprep.subr.mxu1 %v1421_v0  ;;  %1263 = vmatprep.subr.mxu0 %v1421_v0  ;;  %v1433_v2 = vld [vmem:[%s1748_s1] sm:$0xff]  ;;  %v1447_v4 = vld [vmem:[%s1748_s1 + $0x8] sm:$0xff]  ;;  %v1452_v5 = vld [vmem:[%s1748_s1 + $0x18] sm:$0xff] }
   0x3   :  { %1238 = vmatpush3.msra.mxu1 %v1421_v0  ;;  %1264 = vmatpush3.msra.mxu0 %v1421_v0  ;;  %v1460_v6 = vld [vmem:[%s1749_s2 + $0x38] sm:$0xff]  ;;  %v1477_v8 = vld [vmem:[%s1749_s2 + $0x30] sm:$0xff]  ;;  %v1491_v10 = vld [vmem:[%s1749_s2 + $0x28] sm:$0xff] }
   0x4   :  { %1239 = vmatprep.subr.mxu1 %v1426_v1  ;;  %1265 = vmatprep.subr.mxu0 %v1426_v1  ;;  %v1465_v7 = vld [vmem:[%s1749_s2 + $0x78] sm:$0xff]  ;;  %v1482_v9 = vld [vmem:[%s1749_s2 + $0x70] sm:$0xff]  ;;  %v1496_v11 = vld [vmem:[%s1749_s2 + $0x68] sm:$0xff] }
   0x5   :  { %1240 = vmatpush3.msra.mxu1 %v1426_v1  ;;  %1241 = vmatprep.mubr.msk.f32.mxu1 %vm22_vm0, %v1433_v2  ;;  %v1505_v12 = vld [vmem:[%s1749_s2 + $0x20] sm:$0xff]  ;;  %v1519_v14 = vld [vmem:[%s1749_s2 + $0x18] sm:$0xff]  ;;  %v1533_v16 = vld [vmem:[%s1749_s2 + $0x10] sm:$0xff] }
   0x6   :  { %1266 = vmatpush3.msra.mxu0 %v1426_v1  ;;  %1267 = vmatprep.mubr.msk.f32.mxu0 %vm22_vm0, %v1440_v3  ;;  %v1510_v13 = vld [vmem:[%s1749_s2 + $0x60] sm:$0xff]  ;;  %v1524_v15 = vld [vmem:[%s1749_s2 + $0x58] sm:$0xff]  ;;  %v1538_v17 = vld [vmem:[%s1749_s2 + $0x50] sm:$0xff] }
   0x7   :  { %1242 = vmatmul.mubr.msk.f32.vlgmr.msra.gmra.mxu1 %vm22_vm0, %v1447_v4  ;;  %1268 = vmatmul.mubr.msk.f32.vlgmr.msra.gmra.mxu0 %vm22_vm0, %v1452_v5  ;;  %v1547_v18 = vld [vmem:[%s1749_s2 + $0x8] sm:$0xff]  ;;  %v104_v20 = vld [vmem:[%s1749_s2] sm:$0xff]  ;;  %v1576_v22 = vld [vmem:[%s1747_s0 + $0x18] sm:$0xff] }
   0x8   :  { %1244 = vmatprep.subr.mxu1 %v1460_v6  ;;  %1270 = vmatprep.subr.mxu0 %v1465_v7  ;;  %v1558_v19 = vld [vmem:[%s1749_s2 + $0x48] sm:$0xff]  ;;  %v1568_v21 = vld [vmem:[%s1749_s2 + $0x40] sm:$0xff]  ;;  %v1584_v27 = vld [vmem:[%s1747_s0 + $0x10] sm:$0xff] }
   0x9   :  { %1245 = vmatpush3.msra.mxu1 %v1460_v6  ;;  %1271 = vmatpush3.msra.mxu0 %v1465_v7  ;;  %v1591_v28 = vld [vmem:[%s1748_s1 + $0x20] sm:$0xff]  ;;  %v1600_v29 = vld [vmem:[%s1748_s1 + $0x28] sm:$0xff]  ;;  %v1608_v30 = vld [vmem:[%s1749_s2 + $0xb8] sm:$0xff] }
   0xa   :  { %1246 = vmatprep.subr.mxu1 %v1477_v8  ;;  %1272 = vmatprep.subr.mxu0 %v1482_v9  ;;  %v1620_v31 = vld [vmem:[%s1749_s2 + $0xb0] sm:$0xff]  ;;  %v1629_v32 = vld [vmem:[%s1749_s2 + $0xa8] sm:$0xff]  ;;  %v1638_v33 = vld [vmem:[%s1749_s2 + $0xa0] sm:$0xff] }
   0xb   :  { %1247 = vmatpush3.msra.mxu1 %v1477_v8  ;;  %1273 = vmatpush3.msra.mxu0 %v1482_v9  ;;  %v1647_v34 = vld [vmem:[%s1749_s2 + $0x98] sm:$0xff]  ;;  %v1109_v35 = vld [vmem:[%s1749_s2 + $0x90] sm:$0xff]  ;;  %v1108_v36 = vld [vmem:[%s1749_s2 + $0x88] sm:$0xff] }
   0xc   :  { %1248 = vmatprep.subr.mxu1 %v1491_v10  ;;  %1274 = vmatprep.subr.mxu0 %v1496_v11  ;;  %v1671_v37 = vld [vmem:[%s1749_s2 + $0x80] sm:$0xff] }
   0xd   :  { %1249 = vmatpush3.msra.mxu1 %v1491_v10  ;;  %1275 = vmatpush3.msra.mxu0 %v1496_v11  ;;  %v1679_v38 = vld [vmem:[%s1750_s3] ss:$0 sm:$0xff] }
   0xe   :  { %1250 = vmatprep.subr.mxu1 %v1505_v12  ;;  %1276 = vmatprep.subr.mxu0 %v1510_v13 }
   0xf   :  { %1251 = vmatpush3.msra.mxu1 %v1505_v12  ;;  %1277 = vmatpush3.msra.mxu0 %v1510_v13 }
  0x10   :  { %1252 = vmatprep.subr.mxu1 %v1519_v14  ;;  %1278 = vmatprep.subr.mxu0 %v1524_v15 }
  0x11   :  { %1253 = vmatpush3.msra.mxu1 %v1519_v14  ;;  %1279 = vmatpush3.msra.mxu0 %v1524_v15 }
  0x12   :  { %1254 = vmatprep.subr.mxu1 %v1533_v16  ;;  %1280 = vmatprep.subr.mxu0 %v1538_v17 }
  0x13   :  { %1255 = vmatpush3.msra.mxu1 %v1533_v16  ;;  %1281 = vmatpush3.msra.mxu0 %v1538_v17 }
  0x14   :  { %1256 = vmatprep.subr.mxu1 %v1547_v18  ;;  %1282 = vmatprep.subr.mxu0 %v1558_v19 }
  0x15   :  { %1257 = vmatpush3.msra.mxu1 %v1547_v18  ;;  %1283 = vmatpush3.msra.mxu0 %v1558_v19 }
  0x16   :  { %1258 = vmatprep.subr.mxu1 %v104_v20  ;;  %1284 = vmatprep.subr.mxu0 %v1568_v21 }
  0x17   :  { %1259 = vmatpush3.msra.mxu1 %v104_v20  ;;  %1285 = vmatpush3.msra.mxu0 %v1568_v21 }
  0x18   :  { %1289 = vmatprep.subr.mxu1 %v1421_v0  ;;  %1315 = vmatprep.subr.mxu0 %v1576_v22 }
  0xc7   :  { %v1243_v23 = vpop.f32.mrf.mxu1  ;;  %v1269_v24 = vpop.f32.mrf.mxu0 }
  0xc9   :  { %v95_v25 = vpop.f32.mrf.mxu1  ;;  %v275_v26 = vpop.f32.mrf.mxu0 }
  0xca   :  { %1260 = vmatprep.mubr.msk.f32.mxu1 %vm118_vm1, %v95_v25  ;;  %1286 = vmatprep.mubr.msk.f32.mxu0 %vm118_vm1, %v275_v26 }
  0xcb   :  { %1261 = vmatmul.mubr.msk.f32.vlgmr.msra.gmra.mxu1 %vm118_vm1, %v1243_v23  ;;  %1287 = vmatmul.mubr.msk.f32.vlgmr.msra.gmra.mxu0 %vm118_vm1, %v1269_v24 }
  0xcc   :  { %1290 = vmatpush3.msra.mxu1 %v1421_v0  ;;  %1316 = vmatpush3.msra.mxu0 %v1576_v22 }
  0xcd   :  { %1291 = vmatprep.subr.mxu1 %v1426_v1  ;;  %1317 = vmatprep.subr.mxu0 %v1584_v27 }
  0xce   :  { %1292 = vmatpush3.msra.mxu1 %v1426_v1  ;;  %1293 = vmatprep.mubr.msk.f32.mxu1 %vm22_vm0, %v1591_v28 }
  0xcf   :  { %1318 = vmatpush3.msra.mxu0 %v1584_v27  ;;  %1319 = vmatprep.mubr.msk.f32.mxu0 %vm22_vm0, %v1433_v2 }
  0xd0   :  { %1294 = vmatmul.mubr.msk.f32.vlgmr.msra.gmra.mxu1 %vm22_vm0, %v1600_v29  ;;  %1320 = vmatmul.mubr.msk.f32.vlgmr.msra.gmra.mxu0 %vm22_vm0, %v1447_v4 }
  0xd1   :  { %1296 = vmatprep.subr.mxu1 %v1608_v30  ;;  %1322 = vmatprep.subr.mxu0 %v1460_v6 }
  0xd2   :  { %1297 = vmatpush3.msra.mxu1 %v1608_v30  ;;  %1323 = vmatpush3.msra.mxu0 %v1460_v6 }
  0xd3   :  { %1298 = vmatprep.subr.mxu1 %v1620_v31  ;;  %1324 = vmatprep.subr.mxu0 %v1477_v8 }
  0xd4   :  { %1299 = vmatpush3.msra.mxu1 %v1620_v31  ;;  %1325 = vmatpush3.msra.mxu0 %v1477_v8 }
  0xd5   :  { %1300 = vmatprep.subr.mxu1 %v1629_v32  ;;  %1326 = vmatprep.subr.mxu0 %v1491_v10 }
  0xd6   :  { %1301 = vmatpush3.msra.mxu1 %v1629_v32  ;;  %1327 = vmatpush3.msra.mxu0 %v1491_v10 }
  0xd7   :  { %1302 = vmatprep.subr.mxu1 %v1638_v33  ;;  %1328 = vmatprep.subr.mxu0 %v1505_v12 }
  0xd8   :  { %1303 = vmatpush3.msra.mxu1 %v1638_v33  ;;  %1329 = vmatpush3.msra.mxu0 %v1505_v12 }
  0xd9   :  { %1304 = vmatprep.subr.mxu1 %v1647_v34  ;;  %1330 = vmatprep.subr.mxu0 %v1519_v14 }
  0xda   :  { %1305 = vmatpush3.msra.mxu1 %v1647_v34  ;;  %1331 = vmatpush3.msra.mxu0 %v1519_v14 }
  0xdb   :  { %1332 = vmatprep.subr.mxu0 %v1533_v16  ;;  %1306 = vmatprep.subr.mxu1 %v1109_v35 }
  0xdc   :  { %1333 = vmatpush3.msra.mxu0 %v1533_v16  ;;  %1307 = vmatpush3.msra.mxu1 %v1109_v35 }
  0xdd   :  { %1334 = vmatprep.subr.mxu0 %v1547_v18  ;;  %1308 = vmatprep.subr.mxu1 %v1108_v36 }
  0xde   :  { %1335 = vmatpush3.msra.mxu0 %v1547_v18  ;;  %1309 = vmatpush3.msra.mxu1 %v1108_v36 }
  0xdf   :  { %1336 = vmatprep.subr.mxu0 %v104_v20  ;;  %1310 = vmatprep.subr.mxu1 %v1671_v37 }
  0xe0   :  { %1337 = vmatpush3.msra.mxu0 %v104_v20  ;;  %1311 = vmatpush3.msra.mxu1 %v1671_v37 }
  0xe1   :  { %1367 = vmatprep.subr.mxu0 %v1576_v22  ;;  %1341 = vmatprep.subr.mxu1 %v1576_v22 }
 0x18b   :  { %v1262_v39 = vpop.f32.mrf.mxu1  ;;  %v1288_v40 = vpop.f32.mrf.mxu0 }
 0x18c   :  { %v197_v41 = vadd.f32 %v1262_v39, %v1679_v38 }
 0x18d   :  { %v191_v42 = vpop.f32.mrf.mxu1  ;;  %v365_v43 = vpop.f32.mrf.mxu0 }
 0x18e   :  { %v375_v44 = vadd.f32 %v1288_v40, %v197_v41  ;;  %v192_v45 = vadd.f32 %v1679_v38, %v191_v42 }
 0x190   :  { %v374_v46 = vadd.f32 %v365_v43, %v192_v45  ;;  %v1295_v47 = vpop.f32.mrf.mxu1  ;;  %v1321_v48 = vpop.f32.mrf.mxu0 }
 0x192   :  { %v451_v49 = vpop.f32.mrf.mxu1  ;;  %v631_v50 = vpop.f32.mrf.mxu0 }
 0x193   :  { %1312 = vmatprep.mubr.msk.f32.mxu1 %vm118_vm1, %v451_v49  ;;  %1338 = vmatprep.mubr.msk.f32.mxu0 %vm118_vm1, %v631_v50 }
 0x194   :  { %1313 = vmatmul.mubr.msk.f32.vlgmr.msra.gmra.mxu1 %vm118_vm1, %v1295_v47  ;;  %1339 = vmatmul.mubr.msk.f32.vlgmr.msra.gmra.mxu0 %vm118_vm1, %v1321_v48 }
 0x195   :  { %1342 = vmatpush3.msra.mxu1 %v1576_v22  ;;  %1368 = vmatpush3.msra.mxu0 %v1576_v22 }
 0x196   :  { %1343 = vmatprep.subr.mxu1 %v1584_v27  ;;  %1369 = vmatprep.subr.mxu0 %v1584_v27 }
 0x197   :  { %1344 = vmatpush3.msra.mxu1 %v1584_v27  ;;  %1345 = vmatprep.mubr.msk.f32.mxu1 %vm22_vm0, %v1440_v3 }
 0x198   :  { %1370 = vmatpush3.msra.mxu0 %v1584_v27  ;;  %1371 = vmatprep.mubr.msk.f32.mxu0 %vm22_vm0, %v1591_v28 }
 0x199   :  { %1346 = vmatmul.mubr.msk.f32.vlgmr.msra.gmra.mxu1 %vm22_vm0, %v1452_v5  ;;  %1372 = vmatmul.mubr.msk.f32.vlgmr.msra.gmra.mxu0 %vm22_vm0, %v1600_v29 }
 0x19a   :  { %1348 = vmatprep.subr.mxu1 %v1465_v7  ;;  %1374 = vmatprep.subr.mxu0 %v1608_v30 }
 0x19b   :  { %1349 = vmatpush3.msra.mxu1 %v1465_v7  ;;  %1375 = vmatpush3.msra.mxu0 %v1608_v30 }
 0x19c   :  { %1350 = vmatprep.subr.mxu1 %v1482_v9  ;;  %1376 = vmatprep.subr.mxu0 %v1620_v31 }
 0x19d   :  { %1351 = vmatpush3.msra.mxu1 %v1482_v9  ;;  %1377 = vmatpush3.msra.mxu0 %v1620_v31 }
 0x19e   :  { %1352 = vmatprep.subr.mxu1 %v1496_v11  ;;  %1378 = vmatprep.subr.mxu0 %v1629_v32 }
 0x19f   :  { %1353 = vmatpush3.msra.mxu1 %v1496_v11  ;;  %1379 = vmatpush3.msra.mxu0 %v1629_v32 }
 0x1a0   :  { %1354 = vmatprep.subr.mxu1 %v1510_v13  ;;  %1380 = vmatprep.subr.mxu0 %v1638_v33 }
 0x1a1   :  { %1355 = vmatpush3.msra.mxu1 %v1510_v13  ;;  %1381 = vmatpush3.msra.mxu0 %v1638_v33 }
 0x1a2   :  { %1356 = vmatprep.subr.mxu1 %v1524_v15  ;;  %1382 = vmatprep.subr.mxu0 %v1647_v34 }
 0x1a3   :  { %1357 = vmatpush3.msra.mxu1 %v1524_v15  ;;  %1383 = vmatpush3.msra.mxu0 %v1647_v34 }
 0x1a4   :  { %1358 = vmatprep.subr.mxu1 %v1538_v17  ;;  %1384 = vmatprep.subr.mxu0 %v1109_v35 }
 0x1a5   :  { %1359 = vmatpush3.msra.mxu1 %v1538_v17  ;;  %1385 = vmatpush3.msra.mxu0 %v1109_v35 }
 0x1a6   :  { %1360 = vmatprep.subr.mxu1 %v1558_v19  ;;  %1386 = vmatprep.subr.mxu0 %v1108_v36 }
 0x1a7   :  { %1361 = vmatpush3.msra.mxu1 %v1558_v19  ;;  %1387 = vmatpush3.msra.mxu0 %v1108_v36 }
 0x1a8   :  { %1362 = vmatprep.subr.mxu1 %v1568_v21  ;;  %1388 = vmatprep.subr.mxu0 %v1671_v37 }
 0x1a9   :  { %1363 = vmatpush3.msra.mxu1 %v1568_v21  ;;  %1389 = vmatpush3.msra.mxu0 %v1671_v37 }
 0x254   :  { %v1314_v51 = vpop.f32.mrf.mxu1  ;;  %v1340_v52 = vpop.f32.mrf.mxu0 }
 0x255   :  { %v551_v53 = vadd.f32 %v1314_v51, %v375_v44  ;;  %v726_v61 = vadd.f32 %v1340_v52, %v1679_v38 }
 0x256   :  { %v541_v54 = vpop.f32.mrf.mxu1  ;;  %v720_v55 = vpop.f32.mrf.mxu0 }
 0x257   :  { %553 = vst [vmem:[%s1751_s4 + $0x8] sm:$0xff] %v551_v53  ;;  %v550_v56 = vadd.f32 %v541_v54, %v374_v46  ;;  %v721_v0 = vadd.f32 %v1679_v38, %v720_v55 }
 0x259   :  { %552 = vst [vmem:[%s1751_s4] sm:$0xff] %v550_v56  ;;  %v1347_v57 = vpop.f32.mrf.mxu1  ;;  %v1373_v58 = vpop.f32.mrf.mxu0 }
 0x25b   :  { %v803_v59 = vpop.f32.mrf.mxu1  ;;  %v977_v60 = vpop.f32.mrf.mxu0 }
 0x25c   :  { %1364 = vmatprep.mubr.msk.f32.mxu1 %vm118_vm1, %v803_v59  ;;  %1390 = vmatprep.mubr.msk.f32.mxu0 %vm118_vm1, %v977_v60 }
 0x25d   :  { %1365 = vmatmul.mubr.msk.f32.vlgmr.msra.gmra.mxu1 %vm118_vm1, %v1347_v57  ;;  %1391 = vmatmul.mubr.msk.f32.vlgmr.msra.gmra.mxu0 %vm118_vm1, %v1373_v58 }
 0x31d   :  { %v1366_v62 = vpop.f32.mrf.mxu1  ;;  %v1392_v63 = vpop.f32.mrf.mxu0 }
 0x31e   :  { %v902_v1 = vadd.f32 %v1366_v62, %v726_v61 }
 0x31f   :  { %v892_v2 = vpop.f32.mrf.mxu1  ;;  %v1066_v5 = vpop.f32.mrf.mxu0 }
 0x320   :  { %v1076_v3 = vadd.f32 %v1392_v63, %v902_v1  ;;  %v901_v4 = vadd.f32 %v892_v2, %v721_v0 }
 0x322   :  { %1152 = vst [vmem:[%s1751_s4 + $0x18] sm:$0xff] %v1076_v3  ;;  %v1075_v6 = vadd.f32 %v1066_v5, %v901_v4 }
 0x324   :  { %1151 = vst [vmem:[%s1751_s4 + $0x10] sm:$0xff] %v1075_v6 }

</bundles_post_ra>
